<compile_context>
chip_gen: v5e
topology: v5e:2x2
jax: 0.10.0
libtpu: 0.0.40
codegen_flags: <defaults>
</compile_context>

<pallas_src>
import functools

import jax
import jax.numpy as jnp
from jax.experimental import pallas as pl
from jax.experimental.pallas import tpu as pltpu


# ----------------------------------------------------------------------------
# Fused forward kernel:  out = relu(x @ W_eff + b_eff)
#   x_ref : (N, tk)       f32 tile of the flattened (zero-padded-K) input
#   w_ref : (tk, Dout)    bf16 tile of the folded weight
#   b_ref : (1, Dout)     f32 bias
#   o_ref : (N, Dout)     f32 output; doubles as the f32 accumulator (its block
#                         index is constant across the K axis -> VMEM resident)
# ----------------------------------------------------------------------------
def linear_relu_kernel(x_ref, w_ref, b_ref, o_ref):
    k = pl.program_id(0)

    @pl.when(k == 0)
    def _():
        o_ref[...] = jnp.zeros_like(o_ref)

    o_ref[...] += jnp.dot(
        x_ref[...].astype(jnp.bfloat16),
        w_ref[...],
        preferred_element_type=jnp.float32,
    )

    @pl.when(k == pl.num_programs(0) - 1)
    def _():
        o_ref[...] = jnp.maximum(o_ref[...] + b_ref[...], 0.0)


def _k_tiling(K, max_tk=6144):
    """Return (tk, K_pad): tk a multiple of 128, K_pad a multiple of tk >= K."""
    K128 = ((K + 127) // 128) * 128
    if K128 <= max_tk:
        return K128, K128
    cap = max_tk - (max_tk % 128)
    for cand in range(cap, 127, -128):
        if K128 % cand == 0:
            return cand, K128
    # No nice divisor of K128: pad K up to a multiple of the cap instead.
    k_pad = ((K + cap - 1) // cap) * cap
    return cap, k_pad


def fused_linear_relu(x_flat, w_eff, b_eff):
    """relu(x_flat @ w_eff + b_eff); w_eff is the (K_pad, Dout) folded weight."""
    N, K = x_flat.shape
    K_pad, Dout = w_eff.shape
    if K_pad != K:
        x_flat = jnp.pad(x_flat, ((0, 0), (0, K_pad - K)))
    tk, _ = _k_tiling(K_pad)
    assert K_pad % tk == 0 and tk % 128 == 0, (K_pad, tk)
    grid = (K_pad // tk,)

    cost = pl.CostEstimate(
        flops=2 * N * K_pad * Dout,
        transcendentals=0,
        bytes_accessed=4 * N * K_pad + 2 * K_pad * Dout + 4 * Dout + 4 * N * Dout,
    )

    return pl.pallas_call(
        linear_relu_kernel,
        out_shape=jax.ShapeDtypeStruct((N, Dout), jnp.float32),
        grid_spec=pltpu.PrefetchScalarGridSpec(
            num_scalar_prefetch=0,
            grid=grid,
            in_specs=[
                pl.BlockSpec((N, tk), lambda k: (0, k)),
                pl.BlockSpec((tk, Dout), lambda k: (k, 0)),
                pl.BlockSpec((1, Dout), lambda k: (0, 0)),
            ],
            out_specs=pl.BlockSpec((N, Dout), lambda k: (0, 0)),
        ),
        compiler_params=pltpu.CompilerParams(
            dimension_semantics=("arbitrary",),  # K is a reduction axis
        ),
        cost_estimate=cost,
    )(x_flat, w_eff, b_eff)


# ----------------------------------------------------------------------------
# One-time parameter folding: conv(1x1, pad=1) + flatten + Linear composed.
# Done in f32, cast to bf16 at the very end, K zero-padded to the tile size.
# ----------------------------------------------------------------------------
def fold_params(conv_w, conv_b, lin_w, lin_b, H, W):
    Cout, Cin = conv_w.shape
    Dout, F = lin_w.shape
    Hp, Wp = H + 2, W + 2
    assert F == Cout * Hp * Wp, (F, Cout, Hp, Wp)

    lw = lin_w.reshape(Dout, Cout, Hp, Wp)
    lw_int = lw[:, :, 1:-1, 1:-1]  # interior positions see the conv matmul

    # W_eff[(ci, h, w), d] = sum_o conv_w[o, ci] * lin_w[d, (o, h+1, w+1)]
    K = Cin * H * W
    w_eff = jnp.einsum("oc,dohw->chwd", conv_w, lw_int).reshape(K, Dout)

    # conv bias contributes at every padded-output position (border + interior)
    b_eff = lin_b + jnp.einsum("dohw,o->d", lw, conv_b)

    # Pad K to a lane/sublane-aligned multiple of the K tile (zero rows are
    # numerically free) and store the streamed weight as bf16.
    _, K_pad = _k_tiling(K)
    if K_pad != K:
        w_eff = jnp.pad(w_eff, ((0, K_pad - K), (0, 0)))
    return w_eff.astype(jnp.bfloat16), b_eff.reshape(1, Dout).astype(jnp.float32)


def make_forward(conv_w, conv_b, lin_w, lin_b, H, W):
    """Fold once at parameter-load time; return a jitted per-call forward."""
    w_eff, b_eff = fold_params(conv_w, conv_b, lin_w, lin_b, H, W)

    @jax.jit
    def forward(x_nchw):
        N, Cin, Hh, Ww = x_nchw.shape
        return fused_linear_relu(x_nchw.reshape(N, Cin * Hh * Ww), w_eff, b_eff)

    return forward


# ----------------------------------------------------------------------------
# Pure-JAX reference of the original module (for correctness checking only).
# ----------------------------------------------------------------------------
def reference_forward(x, conv_w, conv_b, lin_w, lin_b):
    N = x.shape[0]
    x_pad = jnp.pad(x, ((0, 0), (0, 0), (1, 1), (1, 1)))
    y = jnp.einsum("oc,nchw->nohw", conv_w, x_pad) + conv_b[None, :, None, None]
    v2 = y.reshape(N, -1)
    v3 = v2 @ lin_w.T + lin_b
    return jnp.maximum(v3, 0.0)


if __name__ == "__main__":
    key = jax.random.PRNGKey(0)
    k_x, k_cw, k_cb, k_lw, k_lb = jax.random.split(key, 5)

    # small, consistent shapes
    N, Cin, H, W = 2, 3, 16, 16
    Cout, Dout = 8, 128
    Hp, Wp = H + 2, W + 2
    F = Cout * Hp * Wp  # flattened conv output features

    x = jax.random.normal(k_x, (N, Cin, H, W), dtype=jnp.float32)

    # deterministic parameter init (PyTorch-style uniform fan-in scaling)
    conv_bound = 1.0 / (Cin ** 0.5)
    conv_w = jax.random.uniform(k_cw, (Cout, Cin), jnp.float32, -conv_bound, conv_bound)
    conv_b = jax.random.uniform(k_cb, (Cout,), jnp.float32, -conv_bound, conv_bound)

    lin_bound = 1.0 / (F ** 0.5)
    lin_w = jax.random.uniform(k_lw, (Dout, F), jnp.float32, -lin_bound, lin_bound)
    lin_b = jax.random.uniform(k_lb, (Dout,), jnp.float32, -lin_bound, lin_bound)

    # Fold ONCE at parameter-load time; per-step forward is a single fused
    # Pallas matmul + bias + ReLU streaming bf16 weights.
    forward = make_forward(conv_w, conv_b, lin_w, lin_b, H, W)
    out = jax.block_until_ready(forward(x))

    # correctness vs. the original (unfolded) module semantics
    ref = reference_forward(x, conv_w, conv_b, lin_w, lin_b)
    assert out.shape == (N, Dout), out.shape
    assert bool(jnp.all(out >= 0.0))  # ReLU post-condition
    assert bool(jnp.allclose(out, ref, atol=5e-2, rtol=5e-2)), float(
        jnp.max(jnp.abs(out - ref))
    )
    print("KERNEL_OK")
</pallas_src>

<mosaic_0001>
module attributes {stable_mosaic.version = 11 : i64} {
  func.func @linear_relu_kernel(%arg0: i32, %arg1: memref<2x768xf32, #tpu.memory_space<vmem>>, %arg2: memref<768x128xbf16, #tpu.memory_space<vmem>>, %arg3: memref<1x128xf32, #tpu.memory_space<vmem>>, %arg4: memref<2x128xf32, #tpu.memory_space<vmem>>) attributes {dimension_semantics = [#tpu.dimension_semantics<arbitrary>], iteration_bounds = array<i64: 1>, scalar_prefetch = 0 : i64, scratch_operands = 0 : i64, tpu.core_type = #tpu.core_type<tc>, window_params = [{transform_indices = @transform_0, window_bounds = array<i64: 2, 768>}, {transform_indices = @transform_1, window_bounds = array<i64: 768, 128>}, {pipeline_mode = #tpu.pipeline_mode<synchronous>, transform_indices = @transform_2, window_bounds = array<i64: 1, 128>}, {pipeline_mode = #tpu.pipeline_mode<synchronous>, transform_indices = @transform_3, window_bounds = array<i64: 2, 128>}]} {
    %c0_i32 = arith.constant 0 : i32
    %0 = arith.cmpi eq, %arg0, %c0_i32 : i32
    %1 = arith.extui %0 : i1 to i32
    %c0_i32_0 = arith.constant 0 : i32
    %2 = arith.cmpi ne, %1, %c0_i32_0 : i32
    scf.if %2 {
      %cst_10 = arith.constant 0.000000e+00 : f32
      %13 = vector.broadcast %cst_10 : f32 to vector<2x128xf32>
      %c0_11 = arith.constant 0 : index
      %c0_12 = arith.constant 0 : index
      %14 = vector.load %arg4[%c0_11, %c0_12] : memref<2x128xf32, #tpu.memory_space<vmem>>, vector<2x128xf32>
      tpu.vector_store %arg4[%c0_11, %c0_12], %13 {strides = array<i32>} : memref<2x128xf32, #tpu.memory_space<vmem>>, vector<2x128xf32>,
    } else {
    }
    %c0 = arith.constant 0 : index
    %c0_1 = arith.constant 0 : index
    %3 = vector.load %arg4[%c0, %c0_1] : memref<2x128xf32, #tpu.memory_space<vmem>>, vector<2x128xf32>
    %c0_2 = arith.constant 0 : index
    %c0_3 = arith.constant 0 : index
    %4 = vector.load %arg1[%c0_2, %c0_3] : memref<2x768xf32, #tpu.memory_space<vmem>>, vector<2x768xf32>
    %5 = arith.truncf %4 : vector<2x768xf32> to vector<2x768xbf16>
    %c0_4 = arith.constant 0 : index
    %c0_5 = arith.constant 0 : index
    %6 = vector.load %arg2[%c0_4, %c0_5] : memref<768x128xbf16, #tpu.memory_space<vmem>>, vector<768x128xbf16>
    %cst = arith.constant dense<0.000000e+00> : vector<2x128xf32>
    %7 = tpu.matmul %5, %6, %cst {dimension_numbers = #tpu.dot_dimension_numbers<[1], [0], [0], [1], [0, 0, 1, 1], [], []>} : vector<2x768xbf16>, vector<768x128xbf16>, vector<2x128xf32> -> vector<2x128xf32>
    %8 = arith.addf %3, %7 : vector<2x128xf32>
    %c0_6 = arith.constant 0 : index
    %c0_7 = arith.constant 0 : index
    %9 = vector.load %arg4[%c0_6, %c0_7] : memref<2x128xf32, #tpu.memory_space<vmem>>, vector<2x128xf32>
    tpu.vector_store %arg4[%c0_6, %c0_7], %8 {strides = array<i32>} : memref<2x128xf32, #tpu.memory_space<vmem>>, vector<2x128xf32>,
    %c0_i32_8 = arith.constant 0 : i32
    %10 = arith.cmpi eq, %arg0, %c0_i32_8 : i32
    %11 = arith.extui %10 : i1 to i32
    %c0_i32_9 = arith.constant 0 : i32
    %12 = arith.cmpi ne, %11, %c0_i32_9 : i32
    scf.if %12 {
      %c0_10 = arith.constant 0 : index
      %c0_11 = arith.constant 0 : index
      %13 = vector.load %arg4[%c0_10, %c0_11] : memref<2x128xf32, #tpu.memory_space<vmem>>, vector<2x128xf32>
      %c0_12 = arith.constant 0 : index
      %c0_13 = arith.constant 0 : index
      %14 = vector.load %arg3[%c0_12, %c0_13] : memref<1x128xf32, #tpu.memory_space<vmem>>, vector<1x128xf32>
      %15 = vector.broadcast %14 : vector<1x128xf32> to vector<2x128xf32>
      %16 = arith.addf %13, %15 : vector<2x128xf32>
      %cst_14 = arith.constant 0.000000e+00 : f32
      %17 = vector.broadcast %cst_14 : f32 to vector<2x128xf32>
      %18 = arith.maximumf %16, %17 : vector<2x128xf32>
      %c0_15 = arith.constant 0 : index
      %c0_16 = arith.constant 0 : index
      %19 = vector.load %arg4[%c0_15, %c0_16] : memref<2x128xf32, #tpu.memory_space<vmem>>, vector<2x128xf32>
      tpu.vector_store %arg4[%c0_15, %c0_16], %18 {strides = array<i32>} : memref<2x128xf32, #tpu.memory_space<vmem>>, vector<2x128xf32>,
    } else {
    }
    return
  }
  func.func @transform_0(%arg0: i32) -> (i32, i32) {
    %c0_i32 = arith.constant 0 : i32
    %c0_i32_0 = arith.constant 0 : i32
    return %c0_i32, %arg0 : i32, i32
  }
  func.func @transform_1(%arg0: i32) -> (i32, i32) {
    %c0_i32 = arith.constant 0 : i32
    %c0_i32_0 = arith.constant 0 : i32
    return %arg0, %c0_i32 : i32, i32
  }
  func.func @transform_2(%arg0: i32) -> (i32, i32) {
    %c0_i32 = arith.constant 0 : i32
    %c0_i32_0 = arith.constant 0 : i32
    %c0_i32_1 = arith.constant 0 : i32
    return %c0_i32, %c0_i32_0 : i32, i32
  }
  func.func @transform_3(%arg0: i32) -> (i32, i32) {
    %c0_i32 = arith.constant 0 : i32
    %c0_i32_0 = arith.constant 0 : i32
    %c0_i32_1 = arith.constant 0 : i32
    return %c0_i32, %c0_i32_0 : i32, i32
  }
}

</mosaic_0001>

<bundles_post_ra>
// kernel: forward.1
= control target key start
LH: loop header
LB: loop body
LE: loop exit
PB: predicated region body
PF: predicated region fallthrough
CT: control target
= control target key end

     0   :  { %8 = vsyncpa [#allocation3], 0  ;;  %s892_s0 = inlined_call_operand.vmem [shape: f32[2,768], index: 0, kind: input, shape index: {}]   ;;  %s893_s1 = inlined_call_operand.hbm [shape: bf16[768,128], index: 1, kind: input, shape index: {}]   ;;  %s894_s2 = inlined_call_operand.vmem [shape: f32[1,128], index: 2, kind: input, shape index: {}]   ;;  %s895_s3 = inlined_call_operand.hbm [shape: f32[2,128], index: 3, kind: output, shape index: {}]  }
   0x1   :  { %9 = vsyncpa [#allocation4], 0  ;;  %s16_s14 = sshll.u32 %s893_s1, 4  ;;  %s852_s15 = smov [#allocation2]   ;;  %s17_s14 = int_to_ptr.hbm [resolvable:$true] %s16_s14 }
   0x2   :  { %s18_s16 = sshll.u32 %s852_s15, 4  ;;  %s853_s17 = smov 64   ;;  %s19_s16 = int_to_ptr.vmem [resolvable:$true] %s18_s16 }
   0x3   :  { %s854_s18 = smov 4  }
   0x4   :  { %24 = dma.hbm_to_vmem [thread:$0]  %s17_s14, 6144, %s19_s16, [#allocation3], %s853_s17, %s853_s17, %s854_s18  }
   0x5   :  { %848 = dma.done.wait [#allocation3], 6144  }
   0x6   :  { %849 = vsyncadd [#allocation3], 4294961152  ;;  %v753_v0 = vld [vmem:[#allocation2 + $0x38] sm:$0xff]  ;;  %v752_v2 = vld [vmem:[#allocation2 + $0x30] sm:$0xff]  ;;  %v855_v62 = vmov 0.0   ;;  %s856_s23 = smov [#allocation5]  }
   0x7   :  { %v761_v1 = vld [vmem:[#allocation2 + $0x78] sm:$0xff]  ;;  %446 = vmatpush.bf16.msra.mxu0 %v753_v0  ;;  %v760_v3 = vld [vmem:[#allocation2 + $0x70] sm:$0xff]  ;;  %v751_v8 = vld [vmem:[#allocation2 + $0x28] sm:$0xff]  ;;  %35 = vst [vmem:[#allocation5] sm:$0x3] %v855_v62  ;;  %s542_s24 = sshll.u32 %s856_s23, 4  ;;  %s543_s24 = int_to_ptr.vmem [resolvable:$true] %s542_s24 }
   0x8   :  { %459 = vmatpush.bf16.msra.mxu1 %v761_v1  ;;  %v769_v4 = vld [vmem:[#allocation2 + $0xb8] sm:$0xff]  ;;  %v768_v6 = vld [vmem:[#allocation2 + $0xb0] sm:$0xff]  ;;  %v759_v9 = vld [vmem:[#allocation2 + $0x68] sm:$0xff]  ;;  %s544_s27 = sshll.u32 %s895_s3, 4  ;;  %s545_s27 = int_to_ptr.hbm [resolvable:$true] %s544_s27 }
   0x9   :  { %v777_v5 = vld [vmem:[#allocation2 + $0xf8] sm:$0xff]  ;;  %472 = vmatpush.bf16.msra.mxu2 %v769_v4  ;;  %v776_v7 = vld [vmem:[#allocation2 + $0xf0] sm:$0xff]  ;;  %v767_v10 = vld [vmem:[#allocation2 + $0xa8] sm:$0xff] }
   0xa   :  { %485 = vmatpush.bf16.msra.mxu3 %v777_v5  ;;  %v775_v11 = vld [vmem:[#allocation2 + $0xe8] sm:$0xff]  ;;  %v750_v12 = vld [vmem:[#allocation2 + $0x20] sm:$0xff]  ;;  %v37_v14 = vld [vmem:[%s892_s0] sm:$0xff] }
   0xb   :  { %447 = vmatpush.bf16.msra.mxu0 %v752_v2  ;;  %v758_v13 = vld [vmem:[#allocation2 + $0x60] sm:$0xff]  ;;  %41 = vst [vmem:[#allocation1] ss:$4 sm:$0xff] %v37_v14  ;;  %v749_v17 = vld [vmem:[#allocation2 + $0x18] sm:$0xff]  ;;  %v748_v21 = vld [vmem:[#allocation2 + $0x10] sm:$0xff] }
   0xc   :  { %460 = vmatpush.bf16.msra.mxu1 %v760_v3  ;;  %v766_v15 = vld [vmem:[#allocation2 + $0xa0] sm:$0xff]  ;;  %v757_v18 = vld [vmem:[#allocation2 + $0x58] sm:$0xff]  ;;  %v756_v22 = vld [vmem:[#allocation2 + $0x50] sm:$0xff] }
   0xd   :  { %473 = vmatpush.bf16.msra.mxu2 %v768_v6  ;;  %v774_v16 = vld [vmem:[#allocation2 + $0xe0] sm:$0xff]  ;;  %v765_v19 = vld [vmem:[#allocation2 + $0x98] sm:$0xff]  ;;  %v764_v23 = vld [vmem:[#allocation2 + $0x90] sm:$0xff] }
   0xe   :  { %486 = vmatpush.bf16.msra.mxu3 %v776_v7  ;;  %v773_v20 = vld [vmem:[#allocation2 + $0xd8] sm:$0xff]  ;;  %v772_v24 = vld [vmem:[#allocation2 + $0xd0] sm:$0xff]  ;;  %v38_v25 = vld [vmem:[%s892_s0 + $0x8] sm:$0xf] }
   0xf   :  { %448 = vmatpush.bf16.msra.mxu0 %v751_v8  ;;  %v747_v26 = vld [vmem:[#allocation2 + $0x8] sm:$0xff]  ;;  %43 = vst [vmem:[#allocation1 + $0x20] ss:$4 sm:$0xff] %v38_v25  ;;  %v746_v30 = vld [vmem:[#allocation2] sm:$0xff]  ;;  %v785_v34 = vld [vmem:[#allocation2 + $0x138] sm:$0xff] }
  0x10   :  { %461 = vmatpush.bf16.msra.mxu1 %v759_v9  ;;  %v755_v27 = vld [vmem:[#allocation2 + $0x48] sm:$0xff]  ;;  %v754_v31 = vld [vmem:[#allocation2 + $0x40] sm:$0xff]  ;;  %v793_v35 = vld [vmem:[#allocation2 + $0x178] sm:$0xff] }
  0x11   :  { %474 = vmatpush.bf16.msra.mxu2 %v767_v10  ;;  %v763_v28 = vld [vmem:[#allocation2 + $0x88] sm:$0xff]  ;;  %v762_v36 = vld [vmem:[#allocation2 + $0x80] sm:$0xff]  ;;  %v784_v42 = vld [vmem:[#allocation2 + $0x130] sm:$0xff] }
  0x12   :  { %487 = vmatpush.bf16.msra.mxu3 %v775_v11  ;;  %v771_v29 = vld [vmem:[#allocation2 + $0xc8] sm:$0xff]  ;;  %v44_v32 = vld.sshfl [vmem:[#allocation1] sm:$0xff pattern:$0x73625140]  ;;  %v770_v37 = vld [vmem:[#allocation2 + $0xc0] sm:$0xff] }
  0x13   :  { %449 = vmatpush.bf16.msra.mxu0 %v750_v12  ;;  %v45_v33 = vld.sshfl [vmem:[#allocation1 + $0x8] sm:$0xff pattern:$0x73625140]  ;;  %v56_v38 = vpack.c.bf16 %v44_v32, %v44_v32  ;;  %v46_v40 = vld.sshfl [vmem:[#allocation1 + $0x10] sm:$0xff pattern:$0x73625140] }
  0x14   :  { %462 = vmatpush.bf16.msra.mxu1 %v758_v13  ;;  %v57_v39 = vpack.c.bf16 %v45_v33, %v45_v33  ;;  %v47_v41 = vld.sshfl [vmem:[#allocation1 + $0x18] sm:$0xff pattern:$0x73625140]  ;;  %v58_v44 = vpack.c.bf16 %v46_v40, %v46_v40  ;;  %v783_v46 = vld [vmem:[#allocation2 + $0x128] sm:$0xff]  ;;  %v782_v48 = vld [vmem:[#allocation2 + $0x120] sm:$0xff] }
  0x15   :  { %475 = vmatpush.bf16.msra.mxu2 %v766_v15  ;;  %v792_v43 = vld [vmem:[#allocation2 + $0x170] sm:$0xff]  ;;  %v59_v45 = vpack.c.bf16 %v47_v41, %v47_v41  ;;  %v791_v47 = vld [vmem:[#allocation2 + $0x168] sm:$0xff]  ;;  %v790_v49 = vld [vmem:[#allocation2 + $0x160] sm:$0xff] }
  0x16   :  { %488 = vmatpush.bf16.msra.mxu3 %v774_v16  ;;  %v781_v50 = vld [vmem:[#allocation2 + $0x118] sm:$0xff]  ;;  %v780_v52 = vld [vmem:[#allocation2 + $0x110] sm:$0xff]  ;;  %v779_v54 = vld [vmem:[#allocation2 + $0x108] sm:$0xff] }
  0x17   :  { %450 = vmatpush.bf16.msra.mxu0 %v749_v17  ;;  %v789_v51 = vld [vmem:[#allocation2 + $0x158] sm:$0xff]  ;;  %v788_v53 = vld [vmem:[#allocation2 + $0x150] sm:$0xff]  ;;  %v787_v55 = vld [vmem:[#allocation2 + $0x148] sm:$0xff] }
  0x18   :  { %463 = vmatpush.bf16.msra.mxu1 %v757_v18  ;;  %v778_v56 = vld [vmem:[#allocation2 + $0x100] sm:$0xff]  ;;  %v48_v58 = vld.sshfl [vmem:[#allocation1 + $0x20] sm:$0xff pattern:$0x73625140] }
  0x19   :  { %476 = vmatpush.bf16.msra.mxu2 %v765_v19  ;;  %v786_v57 = vld [vmem:[#allocation2 + $0x140] sm:$0xff]  ;;  %v60_v60 = vpack.c.bf16 %v48_v58, %v48_v58  ;;  %v799_v18 = vld [vmem:[%s894_s2] ss:$0 sm:$0xff] }
  0x1a   :  { %489 = vmatpush.bf16.msra.mxu3 %v773_v20  ;;  %v49_v59 = vld.sshfl [vmem:[#allocation1 + $0x28] sm:$0xff pattern:$0x73625140] }
  0x1b   :  { %451 = vmatpush.bf16.msra.mxu0 %v748_v21  ;;  %v61_v61 = vpack.c.bf16 %v49_v59, %v49_v59  ;;  %v36_v13 = vld [vmem:[#allocation5] sm:$0x3] }
  0x1c   :  { %464 = vmatpush.bf16.msra.mxu1 %v756_v22 }
  0x1d   :  { %477 = vmatpush.bf16.msra.mxu2 %v764_v23 }
  0x1e   :  { %490 = vmatpush.bf16.msra.mxu3 %v772_v24 }
  0x1f   :  { %452 = vmatpush.bf16.msra.mxu0 %v747_v26 }
  0x20   :  { %465 = vmatpush.bf16.msra.mxu1 %v755_v27 }
  0x21   :  { %478 = vmatpush.bf16.msra.mxu2 %v763_v28 }
  0x22   :  { %491 = vmatpush.bf16.msra.mxu3 %v771_v29 }
  0x23   :  { %453 = vmatpush.bf16.msra.mxu0 %v746_v30 }
  0x24   :  { %466 = vmatpush.bf16.msra.mxu1 %v754_v31 }
  0x25   :  { %479 = vmatpush.bf16.msra.mxu2 %v762_v36 }
  0x26   :  { %492 = vmatpush.bf16.msra.mxu3 %v770_v37  ;;  %454 = vmatmul.bf16.vlgmr.msra.gmra.mxu0 %v56_v38 }
  0x27   :  { %498 = vmatpush.bf16.msrb.mxu0 %v785_v34  ;;  %467 = vmatmul.bf16.vlgmr.msra.gmra.mxu1 %v57_v39 }
  0x28   :  { %511 = vmatpush.bf16.msrb.mxu1 %v793_v35  ;;  %480 = vmatmul.bf16.vlgmr.msra.gmra.mxu2 %v58_v44 }
  0x29   :  { %493 = vmatmul.bf16.vlgmr.msra.gmra.mxu3 %v59_v45 }
  0x2b   :  { %499 = vmatpush.bf16.msrb.mxu0 %v784_v42 }
  0x2c   :  { %512 = vmatpush.bf16.msrb.mxu1 %v792_v43 }
  0x2f   :  { %500 = vmatpush.bf16.msrb.mxu0 %v783_v46 }
  0x30   :  { %513 = vmatpush.bf16.msrb.mxu1 %v791_v47 }
  0x33   :  { %501 = vmatpush.bf16.msrb.mxu0 %v782_v48 }
  0x34   :  { %514 = vmatpush.bf16.msrb.mxu1 %v790_v49 }
  0x37   :  { %502 = vmatpush.bf16.msrb.mxu0 %v781_v50 }
  0x38   :  { %515 = vmatpush.bf16.msrb.mxu1 %v789_v51 }
  0x3b   :  { %503 = vmatpush.bf16.msrb.mxu0 %v780_v52 }
  0x3c   :  { %516 = vmatpush.bf16.msrb.mxu1 %v788_v53 }
  0x3f   :  { %504 = vmatpush.bf16.msrb.mxu0 %v779_v54 }
  0x40   :  { %517 = vmatpush.bf16.msrb.mxu1 %v787_v55 }
  0x43   :  { %505 = vmatpush.bf16.msrb.mxu0 %v778_v56 }
  0x44   :  { %518 = vmatpush.bf16.msrb.mxu1 %v786_v57 }
  0x46   :  { %506 = vmatmul.bf16.vlgmr.msrb.gmra.mxu0 %v60_v60 }
  0x47   :  { %519 = vmatmul.bf16.vlgmr.msrb.gmra.mxu1 %v61_v61 }
  0xa3   :  { %v455_v63 = vpop.f32.mrf.mxu0 }
  0xa4   :  { %v468_v0 = vpop.f32.mrf.mxu1 }
  0xa5   :  { %v469_v7 = vadd.f32 %v468_v0, %v455_v63 }
  0xab   :  { %v457_v1 = vpop.f32.mrf.mxu0  ;;  %v481_v3 = vpop.f32.mrf.mxu2 }
  0xac   :  { %v470_v2 = vpop.f32.mrf.mxu1  ;;  %v494_v4 = vpop.f32.mrf.mxu3  ;;  %v482_v8 = vadd.f32 %v481_v3, %v469_v7 }
  0xae   :  { %v495_v9 = vadd.f32 %v494_v4, %v482_v8 }
  0xb3   :  { %v483_v5 = vpop.f32.mrf.mxu2 }
  0xb4   :  { %v496_v6 = vpop.f32.mrf.mxu3 }
  0xc3   :  { %v507_v10 = vpop.f32.mrf.mxu0 }
  0xc4   :  { %v520_v11 = vpop.f32.mrf.mxu1  ;;  %v508_v12 = vadd.f32 %v507_v10, %v495_v9 }
  0xc6   :  { %v521_v14 = vadd.f32 %v520_v11, %v508_v12 }
  0xc8   :  { %v524_v15 = vadd.f32 %v521_v14, %v36_v13 }
  0xca   :  { %525 = vst [vmem:[#allocation5] sm:$0x3] %v524_v15 }
  0xcb   :  { %v509_v16 = vpop.f32.mrf.mxu0 }
  0xcc   :  { %v522_v17 = vpop.f32.mrf.mxu1 }
  0xd1   :  { %v529_v19 = vld [vmem:[#allocation5] sm:$0x3] }
  0xd2   :  { %v534_v20 = vadd.f32 %v799_v18, %v529_v19 }
  0xd4   :  { %v535_v21 = vmax.f32 %v534_v20, 0.0 }
  0xd6   :  { %536 = vst [vmem:[#allocation5] sm:$0x3] %v535_v21 }
  0xd7   :  { %547 = dma.vmem_to_hbm [thread:$0]  %s543_s24, 32, %s545_s27, [#allocation4]  }
  0xd8   :  { %850 = dma.done.wait [#allocation4], 32  }
  0xd9   :  { %851 = vsyncadd [#allocation4], 4294967264 }
  0xda   :  { %552 = vsyncpa [#allocation3], 1 }
  0xdb   :  { %553 = vsyncpa [#allocation4], 1 }

</bundles_post_ra>
